<compile_context>
chip_gen: v7x
topology: tpu7x:2x2x1
jax: 0.10.0
libtpu: 0.0.40
codegen_flags: <defaults>
</compile_context>

<pallas_src>
import math
import jax
import jax.numpy as jnp
from jax import lax
from jax.experimental import pallas as pl
from jax.experimental.pallas import tpu as pltpu

BN_EPS = 1e-5  # PyTorch BatchNorm1d default eps


def attention_mlp_kernel(x_ref, p_ref, o_ref):
    """Single invocation: all heads, whole batch.

    x_ref: (B, H*F)            dense slab, one (8,128) vreg at the demo shape
    p_ref: (H*F + 8, H)        rows [:H*F]  = block-diagonal weight selector
                               row  [H*F]   = bias, rows [H*F+1:] = zero pad
    o_ref: (B, H)

    Op order matches the PyTorch module exactly:
      per-head linear -> + bias -> relu -> BatchNorm1d(heads)(train)
      -> dropout(p=0, identity) -> squeeze(-1) (implied by the (B, H) output).
    """
    B, HF = x_ref.shape
    H = o_ref.shape[1]

    x = x_ref[...]                                  # (B, H*F)
    wsel = p_ref[:HF, :]                            # (H*F, H) block-diag weights
    bias = p_ref[HF:HF + 1, :]                      # (1, H)

    # One MXU pass replaces (VPU multiply + 8 segmented XLU lane reduces):
    #   y[b, h] = sum_f x[b, h*F + f] * w[h, f]
    # HIGHEST precision keeps full-f32 accumulation (faithful to the f32
    # PyTorch forward; also the right call if inputs ever become bf16).
    y = jnp.dot(x, wsel,
                preferred_element_type=jnp.float32,
                precision=lax.Precision.HIGHEST)    # (B, H) f32
    y = y + bias                                    # bias broadcast (1, H)
    y = jnp.maximum(y, 0.0)                         # relu

    # BatchNorm1d(num_features=heads), training mode: per-head statistics over
    # the batch (layer_dim == 1 => no length axis), biased variance, default
    # affine (gamma=1, beta=0).  Stats kept in f32.
    mean = jnp.mean(y, axis=0, keepdims=True)       # (1, H)
    var = jnp.mean(jnp.square(y - mean), axis=0, keepdims=True)
    y = (y - mean) * lax.rsqrt(var + BN_EPS)

    # dropout p=0.0 -> identity; squeeze(-1) implied by the (B, H) output.
    o_ref[...] = y.astype(o_ref.dtype)
    # TODO(synk): BatchNorm running_mean/running_var buffer updates (a
    # training-mode side effect) are not materialized; forward output is
    # unaffected.


def attention_mlp_forward(x_bhf, w_hdf, b_hd):
    """x_bhf: (B, H, F);  w_hdf: (H, D, F) with D == 1;  b_hd: (H, D)."""
    B, H, F = x_bhf.shape
    Hw, D, Fw = w_hdf.shape
    assert (Hw, Fw) == (H, F) and D == 1, "kernel specialized for layer_dims=[1]"
    HF = H * F
    dtype = x_bhf.dtype

    # Dense lane packing: (B, H, F) -> (B, H*F) is a free contiguous reshape.
    x_flat = x_bhf.reshape(B, HF)

    # Block-diagonal weight selector: wsel[h*F + f, h] = w[h, 0, f].
    head_of_row = jnp.repeat(jnp.arange(H), F)                   # (H*F,)
    onehot = jax.nn.one_hot(head_of_row, H, dtype=dtype)         # (H*F, H)
    wsel = onehot * w_hdf.reshape(HF, 1)                         # (H*F, H)

    # Fold the bias into the same array (sublane-padded to 8 extra rows) so
    # the kernel takes a single params DMA instead of separate w and b copies.
    bias_rows = jnp.zeros((8, H), dtype).at[0, :].set(b_hd.reshape(H))
    params = jnp.concatenate([wsel, bias_rows], axis=0)          # (H*F + 8, H)

    vmem_spec = pl.BlockSpec(memory_space=pltpu.MemorySpace.VMEM)
    out = pl.pallas_call(
        attention_mlp_kernel,
        out_shape=jax.ShapeDtypeStruct((B, H), dtype),
        in_specs=[vmem_spec, vmem_spec],
        out_specs=vmem_spec,
    )(x_flat, params)
    return out                                                   # (B, H)


def reference_forward(x_bhf, w_hdf, b_hd):
    """Pure-JAX replica of the PyTorch forward (exact f32, no MXU demotion)."""
    y = jnp.sum(x_bhf[:, :, None, :] * w_hdf[None], axis=-1) + b_hd[None]  # (B,H,1)
    y = jnp.maximum(y, 0.0)
    mean = jnp.mean(y, axis=(0, 2), keepdims=True)
    var = jnp.mean(jnp.square(y - mean), axis=(0, 2), keepdims=True)
    y = (y - mean) / jnp.sqrt(var + BN_EPS)
    return y[..., 0]                                                       # (B, H)


if __name__ == "__main__":
    # Module config: AttentionMLP(heads=4, in_features=32) with defaults.
    heads, in_features = 4, 32
    layer_dims = [1]          # default
    batch = 8
    D = layer_dims[0]

    key = jax.random.PRNGKey(0)
    kx, kw, kb = jax.random.split(key, 3)

    # Deterministic init mirroring reset_parameters():
    #   kaiming_uniform_(w, nonlinearity='leaky_relu'); for a (1, H, D, F)
    #   tensor, fan_in = H * D * F.
    fan_in = heads * D * in_features
    gain = math.sqrt(2.0)                       # calculate_gain('leaky_relu', 0)
    w_bound = gain * math.sqrt(3.0 / fan_in)
    w = jax.random.uniform(kw, (heads, D, in_features), jnp.float32,
                           minval=-w_bound, maxval=w_bound)
    b_bound = 1.0 / math.sqrt(fan_in)
    b = jax.random.uniform(kb, (heads, D), jnp.float32,
                           minval=-b_bound, maxval=b_bound)

    # Input: (batch, heads, in_features), as implied by the forward broadcast.
    x = jax.random.normal(kx, (batch, heads, in_features), jnp.float32)

    fwd = jax.jit(attention_mlp_forward)
    out = jax.block_until_ready(fwd(x, w, b))
    ref = reference_forward(x, w, b)

    assert out.shape == (batch, heads), out.shape
    # 1e-4 tolerance covers the MXU f32 multi-pass accumulation vs the exact
    # VPU reference; errors are ~1e-6 in practice at HIGHEST precision.
    assert jnp.allclose(out, ref, atol=1e-4, rtol=1e-4), \
        f"max abs err = {jnp.max(jnp.abs(out - ref))}"
    print("KERNEL_OK")
</pallas_src>

<mosaic_0001>
module attributes {stable_mosaic.version = 11 : i64} {
  func.func @attention_mlp_kernel(%arg0: memref<8x128xf32, #tpu.memory_space<vmem>>, %arg1: memref<136x4xf32, #tpu.memory_space<vmem>>, %arg2: memref<8x4xf32, #tpu.memory_space<vmem>>) attributes {dimension_semantics = [], scalar_prefetch = 0 : i64, scratch_operands = 0 : i64, tpu.core_type = #tpu.core_type<tc>} {
    %c0 = arith.constant 0 : index
    %c0_0 = arith.constant 0 : index
    %0 = vector.load %arg0[%c0, %c0_0] : memref<8x128xf32, #tpu.memory_space<vmem>>, vector<8x128xf32>
    %c0_1 = arith.constant 0 : index
    %c0_2 = arith.constant 0 : index
    %1 = vector.load %arg1[%c0_1, %c0_2] : memref<136x4xf32, #tpu.memory_space<vmem>>, vector<128x4xf32>
    %c128 = arith.constant 128 : index
    %c0_3 = arith.constant 0 : index
    %2 = vector.load %arg1[%c128, %c0_3] : memref<136x4xf32, #tpu.memory_space<vmem>>, vector<1x4xf32>
    %cst = arith.constant dense<0.000000e+00> : vector<8x4xf32>
    %3 = tpu.matmul %0, %1, %cst {dimension_numbers = #tpu.dot_dimension_numbers<[1], [0], [0], [1], [0, 0, 1, 1], [], []>, precision = #tpu.contract_precision<fp32>} : vector<8x128xf32>, vector<128x4xf32>, vector<8x4xf32> -> vector<8x4xf32>
    %4 = vector.broadcast %2 : vector<1x4xf32> to vector<8x4xf32>
    %5 = arith.addf %3, %4 : vector<8x4xf32>
    %cst_4 = arith.constant 0.000000e+00 : f32
    %6 = vector.broadcast %cst_4 : f32 to vector<8x4xf32>
    %7 = arith.maximumf %5, %6 : vector<8x4xf32>
    %cst_5 = arith.constant dense<0.000000e+00> : vector<4xf32>
    %8 = vector.multi_reduction <add>, %7, %cst_5 [0] : vector<8x4xf32> to vector<4xf32>
    %9 = vector.shape_cast %8 : vector<4xf32> to vector<1x4xf32>
    %cst_6 = arith.constant 8.000000e+00 : f32
    %10 = vector.broadcast %cst_6 : f32 to vector<1x4xf32>
    %11 = arith.divf %9, %10 : vector<1x4xf32>
    %12 = vector.broadcast %11 : vector<1x4xf32> to vector<8x4xf32>
    %13 = arith.subf %7, %12 : vector<8x4xf32>
    %14 = arith.mulf %13, %13 : vector<8x4xf32>
    %cst_7 = arith.constant dense<0.000000e+00> : vector<4xf32>
    %15 = vector.multi_reduction <add>, %14, %cst_7 [0] : vector<8x4xf32> to vector<4xf32>
    %16 = vector.shape_cast %15 : vector<4xf32> to vector<1x4xf32>
    %cst_8 = arith.constant 8.000000e+00 : f32
    %17 = vector.broadcast %cst_8 : f32 to vector<1x4xf32>
    %18 = arith.divf %16, %17 : vector<1x4xf32>
    %19 = vector.broadcast %11 : vector<1x4xf32> to vector<8x4xf32>
    %20 = arith.subf %7, %19 : vector<8x4xf32>
    %cst_9 = arith.constant 9.99999974E-6 : f32
    %21 = vector.broadcast %cst_9 : f32 to vector<1x4xf32>
    %22 = arith.addf %18, %21 : vector<1x4xf32>
    %23 = math.rsqrt %22 : vector<1x4xf32>
    %24 = vector.broadcast %23 : vector<1x4xf32> to vector<8x4xf32>
    %25 = arith.mulf %20, %24 : vector<8x4xf32>
    %c0_10 = arith.constant 0 : index
    %c0_11 = arith.constant 0 : index
    %26 = vector.load %arg2[%c0_10, %c0_11] : memref<8x4xf32, #tpu.memory_space<vmem>>, vector<8x4xf32>
    tpu.vector_store %arg2[%c0_10, %c0_11], %25 {strides = array<i32>} : memref<8x4xf32, #tpu.memory_space<vmem>>, vector<8x4xf32>,
    return
  }
}

</mosaic_0001>

<bundles_post_ra>
// kernel: mul.5
= control target key start
LH: loop header
LB: loop body
LE: loop exit
PB: predicated region body
PF: predicated region fallthrough
CT: control target
= control target key end

     0   :  { %vm7_vm0 = vcmask 261120   ;;  %s37_s8 = smov 32   ;;  %s38_s9 = smov 64   ;;  %vm13_vm1 = vcmask 1048320   ;;  %vm19_vm2 = vcmask 785920   ;;  %vm25_vm3 = vcmask 523520   ;;  %s55_s0 = inlined_call_operand.vmem [shape: f32[4,32], index: 0, kind: input, shape index: {}]   ;;  %s56_s1 = inlined_call_operand.vmem [shape: f32[128], index: 1, kind: output, shape index: {}]  }
   0x1   :  { %v4_v0 = vld [vmem:[%s55_s0] sm:$0xf]  ;;  %s36_s0 = smov 96  }
   0x2   :  { %5 = vst [vmem:[#allocation1] sm:$0xf] %v4_v0 }
   0x9   :  { %v10_v1 = vld [vmem:[#allocation1 + $0x3] sm:$0x1]   ;;  %v22_v2 = vld [vmem:[#allocation1 + $0x1] sm:$0x1]   ;;  %v6_v3 = vld [vmem:[#allocation1] sm:$0x1]  }
   0xa   :  { %11 = vrot.lane.b32.xlu0 %v10_v1, %s36_s0  ;;  %23 = vrot.lane.b32.xlu1 %v22_v2, %s37_s8  ;;  %v16_v4 = vld [vmem:[#allocation1 + $0x2] sm:$0x1]   ;;  %8 = vst.msk [vmem:[#allocation0] sm:$0x1] %vm7_vm0, %v6_v3  }
   0xe   :  { %17 = vrot.lane.b32.xlu0 %v16_v4, %s38_s9 }
  0x7c   :  { %v12_v5 = vpop.permute.xlu0 %11   ;;  %v24_v6 = vpop.permute.xlu1 %23  }
  0x7d   :  { %14 = vst.msk [vmem:[#allocation0] sm:$0x1] %vm13_vm1, %v12_v5  }
  0x80   :  { %v18_v7 = vpop.permute.xlu0 %17  }
  0x81   :  { %20 = vst.msk [vmem:[#allocation0] sm:$0x1] %vm19_vm2, %v18_v7  }
  0x82   :  { %26 = vst.msk [vmem:[#allocation0] sm:$0x1] %vm25_vm3, %v24_v6  }
  0x89   :  { %v30_v8 = vld [vmem:[#allocation0] sm:$0x1] }
  0x8a   :  { %32 = vst [vmem:[%s56_s1] sm:$0x1] %v30_v8 }

// kernel: eq.1
= control target key start
LH: loop header
LB: loop body
LE: loop exit
PB: predicated region body
PF: predicated region fallthrough
CT: control target
= control target key end

     0   :  { %vm7_vm0 = vcmask 261120   ;;  %s37_s8 = smov 32   ;;  %s38_s9 = smov 64   ;;  %vm13_vm1 = vcmask 1048320   ;;  %vm19_vm2 = vcmask 785920   ;;  %vm25_vm3 = vcmask 523520   ;;  %s55_s0 = inlined_call_operand.vmem [shape: s32[4,32], index: 0, kind: input, shape index: {}]   ;;  %s56_s1 = inlined_call_operand.vmem [shape: s32[128], index: 1, kind: output, shape index: {}]  }
   0x1   :  { %v4_v0 = vld [vmem:[%s55_s0] sm:$0xf]  ;;  %s36_s0 = smov 96  }
   0x2   :  { %5 = vst [vmem:[#allocation1] sm:$0xf] %v4_v0 }
   0x9   :  { %v10_v1 = vld [vmem:[#allocation1 + $0x3] sm:$0x1]   ;;  %v22_v2 = vld [vmem:[#allocation1 + $0x1] sm:$0x1]   ;;  %v6_v3 = vld [vmem:[#allocation1] sm:$0x1]  }
   0xa   :  { %11 = vrot.lane.b32.xlu0 %v10_v1, %s36_s0  ;;  %23 = vrot.lane.b32.xlu1 %v22_v2, %s37_s8  ;;  %v16_v4 = vld [vmem:[#allocation1 + $0x2] sm:$0x1]   ;;  %8 = vst.msk [vmem:[#allocation0] sm:$0x1] %vm7_vm0, %v6_v3  }
   0xe   :  { %17 = vrot.lane.b32.xlu0 %v16_v4, %s38_s9 }
  0x7c   :  { %v12_v5 = vpop.permute.xlu0 %11   ;;  %v24_v6 = vpop.permute.xlu1 %23  }
  0x7d   :  { %14 = vst.msk [vmem:[#allocation0] sm:$0x1] %vm13_vm1, %v12_v5  }
  0x80   :  { %v18_v7 = vpop.permute.xlu0 %17  }
  0x81   :  { %20 = vst.msk [vmem:[#allocation0] sm:$0x1] %vm19_vm2, %v18_v7  }
  0x82   :  { %26 = vst.msk [vmem:[#allocation0] sm:$0x1] %vm25_vm3, %v24_v6  }
  0x89   :  { %v30_v8 = vld [vmem:[#allocation0] sm:$0x1] }
  0x8a   :  { %32 = vst [vmem:[%s56_s1] sm:$0x1] %v30_v8 }

// kernel: attention_mlp_forward.1
= control target key start
LH: loop header
LB: loop body
LE: loop exit
PB: predicated region body
PF: predicated region fallthrough
CT: control target
= control target key end

     0   :  { %v1175_v0 = vmov 0.0|0.0   ;;  %vm1176_vm0 = vmmov 0   ;;  %v1177_v8 = vmov 0.0   ;;  %vm675_vm1 = vcmask 31744   ;;  %s1500_s1 = inlined_call_operand.vmem [shape: f32[136,4], index: 1, kind: input, shape index: {}]   ;;  %s1501_s0 = inlined_call_operand.vmem [shape: f32[8,128], index: 0, kind: input, shape index: {}]   ;;  %s1502_s2 = inlined_call_operand.vmem [shape: f32[8,4], index: 2, kind: output, shape index: {}]  }
   0x1   :  { %1016 = vmatprep.subr.bf16.mxu1 %v1175_v0  ;;  %1088 = vmatprep.subr.bf16.mxu0 %v1175_v0  ;;  %v12_v1 = vld [vmem:[%s1500_s1] sm:$0xff]  ;;  %v13_v2 = vld [vmem:[%s1500_s1 + $0x8] sm:$0xff]  ;;  %v14_v3 = vld [vmem:[%s1500_s1 + $0x10] sm:$0xff] }
   0x2   :  { %v34_v4 = vand.u32 4294901760, %v12_v1  ;;  %v37_v5 = vand.u32 4294901760, %v13_v2  ;;  %v15_v6 = vld [vmem:[%s1500_s1 + $0x18] sm:$0xff]  ;;  %v40_v7 = vand.u32 4294901760, %v14_v3  ;;  %838 = vmatprep.mubr.msk.f32.mxu1 %vm1176_vm0, %v1177_v8  ;;  %943 = vmatprep.mubr.msk.f32.mxu0 %vm1176_vm0, %v1177_v8  ;;  %v16_v10 = vld [vmem:[%s1500_s1 + $0x20] sm:$0xff]  ;;  %v17_v11 = vld [vmem:[%s1500_s1 + $0x28] sm:$0xff] }
   0x3   :  { %v43_v9 = vand.u32 4294901760, %v15_v6  ;;  %v46_v14 = vand.u32 4294901760, %v16_v10  ;;  %v49_v15 = vand.u32 4294901760, %v17_v11  ;;  %v18_v16 = vld [vmem:[%s1500_s1 + $0x30] sm:$0xff]  ;;  %v19_v17 = vld [vmem:[%s1500_s1 + $0x38] sm:$0xff]  ;;  %v1240_v21 = vld [vmem:[%s1500_s1 + $0x40] sm:$0xff] }
   0x4   :  { %v1217_v12 = vpack.c.bf16 %v37_v5, %v34_v4  ;;  %v52_v19 = vand.u32 4294901760, %v18_v16  ;;  %v55_v20 = vand.u32 4294901760, %v19_v17  ;;  %v1245_v22 = vld [vmem:[%s1500_s1 + $0x48] sm:$0xff]  ;;  %v58_v24 = vand.u32 4294901760, %v1240_v21  ;;  %v11_v26 = vld [vmem:[%s1501_s0] sm:$0xff]  ;;  %v1261_v27 = vld [vmem:[%s1500_s1 + $0x50] sm:$0xff] }
   0x5   :  { %v1221_v13 = vpack.c.bf16 %v43_v9, %v40_v7  ;;  %v1233_v18 = vpack.c.bf16 %v49_v15, %v46_v14  ;;  %v61_v25 = vand.u32 4294901760, %v1245_v22  ;;  %v1266_v28 = vld [vmem:[%s1500_s1 + $0x58] sm:$0xff]  ;;  %v1268_v29 = vsub.f32 %v12_v1, %v34_v4  ;;  %v1283_v35 = vld [vmem:[%s1500_s1 + $0x60] sm:$0xff]  ;;  %v1290_v36 = vld [vmem:[%s1500_s1 + $0x68] sm:$0xff] }
   0x6   :  { %1018 = vmatpush3.bf16.msra.mxu1 %v1217_v12  ;;  %1090 = vmatpush3.bf16.msra.mxu0 %v1217_v12  ;;  %v1249_v23 = vpack.c.bf16 %v55_v20, %v52_v19  ;;  %v1270_v30 = vand.u32 4294901760, %v11_v26  ;;  %v1272_v31 = vsub.f32 %v13_v2, %v37_v5  ;;  %v64_v33 = vand.u32 4294901760, %v1261_v27  ;;  %v1312_v43 = vld [vmem:[%s1500_s1 + $0x70] sm:$0xff]  ;;  %v1317_v44 = vld [vmem:[%s1500_s1 + $0x78] sm:$0xff] }
   0x7   :  { %1019 = vmatprep.subr.bf16.mxu1 %v1175_v0  ;;  %1091 = vmatprep.subr.bf16.mxu0 %v1175_v0  ;;  %v1276_v32 = vpack.c.bf16 %v61_v25, %v58_v24  ;;  %v67_v34 = vand.u32 4294901760, %v1266_v28  ;;  %v1292_v37 = vsub.f32 %v14_v3, %v40_v7  ;;  %v1294_v38 = vsub.f32 %v15_v6, %v43_v9 }
   0x8   :  { %v70_v39 = vand.u32 4294901760, %v1283_v35  ;;  %v1298_v40 = vsub.f32 %v11_v26, %v1270_v30  ;;  %v73_v42 = vand.u32 4294901760, %v1290_v36  ;;  %v127_v45 = vand.u32 4294901760, %v1268_v29 }
   0x9   :  { %v1306_v41 = vpack.c.bf16 %v67_v34, %v64_v33  ;;  %v134_v46 = vand.u32 4294901760, %v1272_v31  ;;  %v1323_v47 = vsub.f32 %v16_v10, %v46_v14  ;;  %v1325_v48 = vsub.f32 %v17_v11, %v49_v15 }
   0xa   :  { %1021 = vmatpush3.bf16.msra.mxu1 %v1221_v13  ;;  %1093 = vmatpush3.bf16.msra.mxu0 %v1221_v13  ;;  %v76_v49 = vand.u32 4294901760, %v1312_v43  ;;  %v79_v50 = vand.u32 4294901760, %v1317_v44  ;;  %v116_v51 = vand.u32 4294901760, %v1298_v40  ;;  %v141_v52 = vand.u32 4294901760, %v1292_v37 }
   0xb   :  { %1022 = vmatprep.subr.bf16.mxu1 %v1175_v0  ;;  %1094 = vmatprep.subr.bf16.mxu0 %v1175_v0  ;;  %v1337_v53 = vpack.c.bf16 %v73_v42, %v70_v39  ;;  %v128_v54 = vsub.f32 %v1268_v29, %v127_v45  ;;  %v135_v55 = vsub.f32 %v1272_v31, %v134_v46  ;;  %v148_v56 = vand.u32 4294901760, %v1294_v38 }
   0xc   :  { %v1344_v57 = vsub.f32 %v18_v16, %v52_v19  ;;  %v1346_v58 = vsub.f32 %v19_v17, %v55_v20  ;;  %v117_v59 = vsub.f32 %v1298_v40, %v116_v51  ;;  %v142_v60 = vsub.f32 %v1292_v37, %v141_v52 }
   0xd   :  { %v155_v61 = vand.u32 4294901760, %v1323_v47  ;;  %v162_v62 = vand.u32 4294901760, %v1325_v48  ;;  %v1358_v63 = vpack.c.bf16 %v79_v50, %v76_v49  ;;  %v129_v1 = vand.u32 4294901760, %v128_v54 }
   0xe   :  { %1024 = vmatpush3.bf16.msra.mxu1 %v1233_v18  ;;  %1096 = vmatpush3.bf16.msra.mxu0 %v1233_v18  ;;  %v136_v2 = vand.u32 4294901760, %v135_v55  ;;  %v149_v3 = vsub.f32 %v1294_v38, %v148_v56  ;;  %v1364_v4 = vsub.f32 %v1240_v21, %v58_v24  ;;  %v1367_v5 = vsub.f32 %v1245_v22, %v61_v25 }
   0xf   :  { %1025 = vmatprep.subr.bf16.mxu1 %v1175_v0  ;;  %1097 = vmatprep.subr.bf16.mxu0 %v1175_v0  ;;  %v1113_v6 = vpack.c.bf16 %v134_v46, %v127_v45  ;;  %v118_v7 = vand.u32 4294901760, %v117_v59  ;;  %v143_v9 = vand.u32 4294901760, %v142_v60  ;;  %v156_v10 = vsub.f32 %v1323_v47, %v155_v61 }
  0x10   :  { %v163_v11 = vsub.f32 %v1325_v48, %v162_v62  ;;  %v1041_v14 = vpack.c.bf16 %v136_v2, %v129_v1  ;;  %v150_v15 = vand.u32 4294901760, %v149_v3  ;;  %v169_v16 = vand.u32 4294901760, %v1344_v57 }
  0x11   :  { %v176_v17 = vand.u32 4294901760, %v1346_v58  ;;  %v1380_v19 = vsub.f32 %v1261_v27, %v64_v33  ;;  %v1385_v20 = vsub.f32 %v1266_v28, %v67_v34  ;;  %v1116_v21 = vpack.c.bf16 %v148_v56, %v141_v52 }
  0x12   :  { %1027 = vmatpush3.bf16.msra.mxu1 %v1249_v23  ;;  %1099 = vmatpush3.bf16.msra.mxu0 %v1249_v23  ;;  %v157_v22 = vand.u32 4294901760, %v156_v10  ;;  %v164_v24 = vand.u32 4294901760, %v163_v11  ;;  %v183_v25 = vand.u32 4294901760, %v1364_v4  ;;  %v1044_v26 = vpack.c.bf16 %v150_v15, %v143_v9 }
  0x13   :  { %1028 = vmatprep.subr.bf16.mxu1 %v1175_v0  ;;  %1100 = vmatprep.subr.bf16.mxu0 %v1175_v0  ;;  %v170_v45 = vsub.f32 %v1344_v57, %v169_v16  ;;  %v177_v27 = vsub.f32 %v1346_v58, %v176_v17  ;;  %v190_v33 = vand.u32 4294901760, %v1367_v5  ;;  %v1396_v28 = vsub.f32 %v1283_v35, %v70_v39 }
  0x14   :  { %v1401_v34 = vsub.f32 %v1290_v36, %v73_v42  ;;  %v1047_v46 = vpack.c.bf16 %v164_v24, %v157_v22  ;;  %v184_v52 = vsub.f32 %v1364_v4, %v183_v25  ;;  %v197_v54 = vand.u32 4294901760, %v1380_v19 }
  0x15   :  { %v171_v35 = vand.u32 4294901760, %v170_v45  ;;  %v178_v39 = vand.u32 4294901760, %v177_v27  ;;  %v191_v55 = vsub.f32 %v1367_v5, %v190_v33  ;;  %v204_v36 = vand.u32 4294901760, %v1385_v20 }
  0x16   :  { %1030 = vmatpush3.bf16.msra.mxu1 %v1276_v32  ;;  %1102 = vmatpush3.bf16.msra.mxu0 %v1276_v32  ;;  %v1416_v42 = vsub.f32 %v1312_v43, %v76_v49  ;;  %v1421_v56 = vsub.f32 %v1317_v44, %v79_v50  ;;  %v1122_v59 = vpack.c.bf16 %v176_v17, %v169_v16  ;;  %v185_v60 = vand.u32 4294901760, %v184_v52 }
  0x17   :  { %1031 = vmatprep.subr.bf16.mxu1 %v1175_v0  ;;  %1103 = vmatprep.subr.bf16.mxu0 %v1175_v0  ;;  %v1050_v1 = vpack.c.bf16 %v178_v39, %v171_v35  ;;  %v192_v2 = vand.u32 4294901760, %v191_v55  ;;  %v205_v3 = vsub.f32 %v1385_v20, %v204_v36  ;;  %v218_v43 = vand.u32 4294901760, %v1401_v34 }
  0x18   :  { %v1125_v44 = vpack.c.bf16 %v190_v33, %v183_v25  ;;  %v232_v11 = vand.u32 4294901760, %v1421_v56 }
  0x19   :  { %v206_v9 = vand.u32 4294901760, %v205_v3  ;;  %v219_v10 = vsub.f32 %v1401_v34, %v218_v43 }
  0x1a   :  { %1033 = vmatpush3.bf16.msra.mxu1 %v1306_v41  ;;  %1105 = vmatpush3.bf16.msra.mxu0 %v1306_v41  ;;  %v233_v22 = vsub.f32 %v1421_v56, %v232_v11 }
  0x1b   :  { %1034 = vmatprep.subr.bf16.mxu1 %v1175_v0  ;;  %1106 = vmatprep.subr.bf16.mxu0 %v1175_v0  ;;  %v220_v17 = vand.u32 4294901760, %v219_v10 }
  0x1c   :  { %v234_v45 = vand.u32 4294901760, %v233_v22 }
  0x1e   :  { %1036 = vmatpush3.bf16.msra.mxu1 %v1337_v53  ;;  %1108 = vmatpush3.bf16.msra.mxu0 %v1337_v53 }
  0x1f   :  { %1037 = vmatprep.subr.bf16.mxu1 %v1175_v0  ;;  %1109 = vmatprep.subr.bf16.mxu0 %v1175_v0 }
  0x22   :  { %1039 = vmatpush3.bf16.msra.mxu1 %v1358_v63  ;;  %1111 = vmatpush3.bf16.msra.mxu0 %v1358_v63 }
  0x23   :  { %1040 = vmatprep.subr.bf16.mxu1 %v1175_v0  ;;  %1112 = vmatprep.subr.bf16.mxu0 %v1175_v0 }
  0x25   :  { %839 = vmatmul.mubr.f32.vlgmr.msra.gmra.mrb[0].mxu1 %v118_v7  ;;  %944 = vmatmul.mubr.f32.vlgmr.msra.gmra.mrb[0].mxu0 %v116_v51  ;;  %v1119_v51 = vpack.c.bf16 %v162_v62, %v155_v61  ;;  %v198_v61 = vsub.f32 %v1380_v19, %v197_v54  ;;  %v211_v62 = vand.u32 4294901760, %v1396_v28  ;;  %v1053_v7 = vpack.c.bf16 %v192_v2, %v185_v60 }
  0x26   :  { %1042 = vmatpush3.bf16.msra.mxu1 %v1041_v14  ;;  %1114 = vmatpush3.bf16.msra.mxu0 %v1113_v6  ;;  %v225_v6 = vand.u32 4294901760, %v1416_v42  ;;  %v1128_v14 = vpack.c.bf16 %v204_v36, %v197_v54 }
  0x27   :  { %1043 = vmatprep.subr.bf16.mxu1 %v1175_v0  ;;  %1115 = vmatprep.subr.bf16.mxu0 %v1175_v0  ;;  %v199_v49 = vand.u32 4294901760, %v198_v61  ;;  %v212_v50 = vsub.f32 %v1396_v28, %v211_v62  ;;  %v1131_v25 = vpack.c.bf16 %v218_v43, %v211_v62 }
  0x28   :  { %873 = vmatprep.mubr.msk.f32.mxu1 %vm1176_vm0, %v1177_v8  ;;  %978 = vmatprep.mubr.msk.f32.mxu0 %vm1176_vm0, %v1177_v8  ;;  %v1134_v33 = vpack.c.bf16 %v232_v11, %v225_v6 }
  0x29   :  { %v213_v15 = vand.u32 4294901760, %v212_v50  ;;  %v1056_v16 = vpack.c.bf16 %v206_v9, %v199_v49 }
  0x2a   :  { %1045 = vmatpush3.bf16.msra.mxu1 %v1044_v26  ;;  %1117 = vmatpush3.bf16.msra.mxu0 %v1116_v21  ;;  %v226_v21 = vsub.f32 %v1416_v42, %v225_v6 }
  0x2b   :  { %1046 = vmatprep.subr.bf16.mxu1 %v1175_v0  ;;  %1118 = vmatprep.subr.bf16.mxu0 %v1175_v0  ;;  %v1059_v24 = vpack.c.bf16 %v220_v17, %v213_v15 }
  0x2c   :  { %v227_v26 = vand.u32 4294901760, %v226_v21 }
  0x2e   :  { %1048 = vmatpush3.bf16.msra.mxu1 %v1047_v46  ;;  %1120 = vmatpush3.bf16.msra.mxu0 %v1119_v51  ;;  %v1062_v27 = vpack.c.bf16 %v234_v45, %v227_v26  ;;  %v1065_v46 = vpack.c.bf16 %v1272_v31, %v1268_v29  ;;  %v1068_v51 = vpack.c.bf16 %v1294_v38, %v1292_v37  ;;  %v703_v31 = vld [vmem:[%s1500_s1 + $0x80] ss:$0 sm:$0xff] }
  0x2f   :  { %1049 = vmatprep.subr.bf16.mxu1 %v1175_v0  ;;  %1121 = vmatprep.subr.bf16.mxu0 %v1175_v0  ;;  %v1071_v29 = vpack.c.bf16 %v1325_v48, %v1323_v47 }
  0x32   :  { %1051 = vmatpush3.bf16.msra.mxu1 %v1050_v1  ;;  %1123 = vmatpush3.bf16.msra.mxu0 %v1122_v59 }
  0x33   :  { %1052 = vmatprep.subr.bf16.mxu1 %v1175_v0  ;;  %1124 = vmatprep.subr.bf16.mxu0 %v1175_v0 }
  0x36   :  { %1054 = vmatpush3.bf16.msra.mxu1 %v1053_v7  ;;  %1126 = vmatpush3.bf16.msra.mxu0 %v1125_v44 }
  0x37   :  { %1055 = vmatprep.subr.bf16.mxu1 %v1175_v0  ;;  %1127 = vmatprep.subr.bf16.mxu0 %v1175_v0 }
  0x3a   :  { %1057 = vmatpush3.bf16.msra.mxu1 %v1056_v16  ;;  %1129 = vmatpush3.bf16.msra.mxu0 %v1128_v14 }
  0x3b   :  { %1058 = vmatprep.subr.bf16.mxu1 %v1175_v0  ;;  %1130 = vmatprep.subr.bf16.mxu0 %v1175_v0 }
  0x3e   :  { %1060 = vmatpush3.bf16.msra.mxu1 %v1059_v24  ;;  %1132 = vmatpush3.bf16.msra.mxu0 %v1131_v25 }
  0x3f   :  { %1061 = vmatprep.subr.bf16.mxu1 %v1175_v0  ;;  %1133 = vmatprep.subr.bf16.mxu0 %v1175_v0 }
  0x42   :  { %1063 = vmatpush3.bf16.msra.mxu1 %v1062_v27  ;;  %1135 = vmatpush3.bf16.msra.mxu0 %v1134_v33 }
  0x43   :  { %1064 = vmatprep.subr.bf16.mxu1 %v1175_v0  ;;  %1136 = vmatprep.subr.bf16.mxu0 %v1175_v0 }
  0x45   :  { %874 = vmatmul.mubr.f32.vlgmr.msra.gmra.mrb[0].mxu1 %v1270_v30  ;;  %979 = vmatmul.mubr.f32.vlgmr.msra.gmra.mrb[0].mxu0 %v1270_v30 }
  0x46   :  { %1066 = vmatpush3.bf16.msra.mxu1 %v1065_v46  ;;  %1138 = vmatpush3.bf16.msra.mxu0 %v1217_v12  ;;  %v1074_v12 = vpack.c.bf16 %v1346_v58, %v1344_v57 }
  0x47   :  { %1067 = vmatprep.subr.bf16.mxu1 %v1175_v0  ;;  %1139 = vmatprep.subr.bf16.mxu0 %v1175_v0 }
  0x48   :  { %908 = vmatprep.mubr.msk.f32.mxu1 %vm1176_vm0, %v1177_v8  ;;  %1013 = vmatprep.mubr.msk.f32.mxu0 %vm1176_vm0, %v1177_v8  ;;  %v1077_v8 = vpack.c.bf16 %v1367_v5, %v1364_v4 }
  0x4a   :  { %1069 = vmatpush3.bf16.msra.mxu1 %v1068_v51  ;;  %1141 = vmatpush3.bf16.msra.mxu0 %v1221_v13  ;;  %v1080_v13 = vpack.c.bf16 %v1385_v20, %v1380_v19 }
  0x4b   :  { %1070 = vmatprep.subr.bf16.mxu1 %v1175_v0  ;;  %1142 = vmatprep.subr.bf16.mxu0 %v1175_v0 }
  0x4e   :  { %1072 = vmatpush3.bf16.msra.mxu1 %v1071_v29  ;;  %1144 = vmatpush3.bf16.msra.mxu0 %v1233_v18  ;;  %v1083_v18 = vpack.c.bf16 %v1401_v34, %v1396_v28 }
  0x4f   :  { %1073 = vmatprep.subr.bf16.mxu1 %v1175_v0  ;;  %1145 = vmatprep.subr.bf16.mxu0 %v1175_v0 }
  0x52   :  { %1075 = vmatpush3.bf16.msra.mxu1 %v1074_v12  ;;  %1147 = vmatpush3.bf16.msra.mxu0 %v1249_v23  ;;  %v1086_v23 = vpack.c.bf16 %v1421_v56, %v1416_v42 }
  0x53   :  { %1076 = vmatprep.subr.bf16.mxu1 %v1175_v0  ;;  %1148 = vmatprep.subr.bf16.mxu0 %v1175_v0 }
  0x56   :  { %1078 = vmatpush3.bf16.msra.mxu1 %v1077_v8  ;;  %1150 = vmatpush3.bf16.msra.mxu0 %v1276_v32 }
  0x57   :  { %1079 = vmatprep.subr.bf16.mxu1 %v1175_v0  ;;  %1151 = vmatprep.subr.bf16.mxu0 %v1175_v0 }
  0x5a   :  { %1081 = vmatpush3.bf16.msra.mxu1 %v1080_v13  ;;  %1153 = vmatpush3.bf16.msra.mxu0 %v1306_v41 }
  0x5b   :  { %1082 = vmatprep.subr.bf16.mxu1 %v1175_v0  ;;  %1154 = vmatprep.subr.bf16.mxu0 %v1175_v0 }
  0x5e   :  { %1084 = vmatpush3.bf16.msra.mxu1 %v1083_v18  ;;  %1156 = vmatpush3.bf16.msra.mxu0 %v1337_v53 }
  0x5f   :  { %1085 = vmatprep.subr.bf16.mxu1 %v1175_v0  ;;  %1157 = vmatprep.subr.bf16.mxu0 %v1175_v0 }
  0x62   :  { %1087 = vmatpush3.bf16.msra.mxu1 %v1086_v23  ;;  %1159 = vmatpush3.bf16.msra.mxu0 %v1358_v63 }
  0x65   :  { %909 = vmatmul.mubr.f32.vlgmr.msra.gmra.mrb[0].mxu1 %v1298_v40  ;;  %1014 = vmatmul.mubr.f32.vlgmr.msra.gmra.mrb[0].mxu0 %v1270_v30 }
 0x138   :  { %v375_v32 = vpop.f32.mrb[0].mxu1  ;;  %v670_v37 = vpop.f32.mrb[0].mxu0 }
 0x139   :  { %v1160_v38 = vadd.f32 %v703_v31, %v375_v32  ;;  %v910_v41 = vpop.f32.mrb[1].mxu1  ;;  %v1015_v47 = vpop.f32.mrb[1].mxu0 }
 0x13b   :  { %v1161_v48 = vadd.f32 %v1160_v38, %v670_v37 }
 0x13d   :  { %v674_v53 = vmax.f32 %v1161_v48, 0.0 }
 0x13f   :  { %v676_v0 = vsel %vm675_vm1, %v674_v53, 0.0 }
 0x140   :  { %v677_v57 = vrot.slane %v676_v0, 4 }
 0x142   :  { %v678_v58 = vadd.f32 %v677_v57, %v676_v0 }
 0x144   :  { %v679_v63 = vrot.slane %v678_v58, 2 }
 0x146   :  { %v680_v40 = vadd.f32 %v679_v63, %v678_v58 }
 0x148   :  { %v681_v4 = vrot.slane %v680_v40, 1 }
 0x14a   :  { %v682_v30 = vadd.f32 %v681_v4, %v680_v40 }
 0x14c   :  { %v684_v5 = vmul.f32 0.125, %v682_v30 }
 0x14e   :  { %v685_v19 = vsub.f32 %v674_v53, %v684_v5 }
 0x150   :  { %v686_v20 = vmul.f32 %v685_v19, %v685_v19 }
 0x152   :  { %v687_v28 = vsel %vm675_vm1, %v686_v20, 0.0 }
 0x153   :  { %v688_v34 = vrot.slane %v687_v28, 4 }
 0x155   :  { %v689_v52 = vadd.f32 %v688_v34, %v687_v28 }
 0x157   :  { %v690_v54 = vrot.slane %v689_v52, 2 }
 0x159   :  { %v691_v35 = vadd.f32 %v690_v54, %v689_v52 }
 0x15b   :  { %v692_v39 = vrot.slane %v691_v35, 1 }
 0x15d   :  { %v693_v55 = vadd.f32 %v692_v39, %v691_v35 }
 0x15f   :  { %v694_v36 = vmul.f32 0.125, %v693_v55 }
 0x161   :  { %v695_v42 = vadd.f32 1e-05, %v694_v36 }
 0x163   :  { %1173 = vrsqrt.f32 %v695_v42 }
 0x16d   :  { %v1174_v56 = vpop.eup %1173 }
 0x16e   :  { %v697_v59 = vmul.f32 %v1174_v56, %v685_v19 }
 0x170   :  { %698 = vst.msk [vmem:[%s1502_s2] sm:$0xff] %vm675_vm1, %v697_v59 }

</bundles_post_ra>
